<compile_context>
chip_gen: v5e
topology: v5e:2x2
jax: 0.10.0
libtpu: 0.0.40
codegen_flags: <defaults>
</compile_context>

<pallas_src>
import functools
import math

import jax
import jax.numpy as jnp
from jax.experimental import pallas as pl
from jax.experimental.pallas import tpu as pltpu


_SUBLANE = 8
_VMEM_TILE_BUDGET = 24 * 1024 * 1024   # sizing target: resident weights + pipelined tiles
_VMEM_LIMIT_BYTES = 48 * 1024 * 1024   # scoped VMEM limit (< v7x's 64 MiB physical)


def _gelu_tanh(x):
    c = math.sqrt(2.0 / math.pi)
    return 0.5 * x * (1.0 + jnp.tanh(c * (x + 0.044715 * x * x * x)))


def _round_up(a, b):
    return (a + b - 1) // b * b


def _dsize(dt):
    return jnp.dtype(dt).itemsize


def _const_spec(shape, single_buffer=True):
    # Resident operand (weights / biases): constant index_map; single-buffer it so the
    # largest VMEM buffers are not allocated twice (biggest relief on v7x's 64 MiB).
    idx = lambda i, _n=len(shape): (0,) * _n
    if single_buffer:
        return pl.BlockSpec(shape, idx, pipeline_mode=pl.Buffered(buffer_count=1))
    return pl.BlockSpec(shape, idx)


def _compiler_params():
    return pltpu.CompilerParams(
        dimension_semantics=("parallel",),
        vmem_limit_bytes=_VMEM_LIMIT_BYTES,
    )


def _pallas_mlp_call(kernel, out_shape, grid, x_spec, const_shapes, out_spec, args):
    def build(single_buffer):
        in_specs = [x_spec] + [_const_spec(s, single_buffer) for s in const_shapes]
        return pl.pallas_call(
            kernel,
            out_shape=out_shape,
            grid=grid,
            in_specs=in_specs,
            out_specs=out_spec,
            compiler_params=_compiler_params(),
        )(*args)

    try:
        return build(True)
    except Exception:
        # Fallback: default double-buffering if single-buffered specs are rejected.
        return build(False)


# ----------------------------------------------------------------------------
# use_conv1=False : Linear -> GELU -> Linear, fused
# ----------------------------------------------------------------------------
def _mlp_linear_kernel(x_ref, w1_ref, b1_ref, w2_ref, b2_ref, o_ref):
    x = x_ref[...]                                                    # (tm, C_in) bf16
    h = jnp.dot(x, w1_ref[...], preferred_element_type=jnp.float32) + b1_ref[...]
    h = _gelu_tanh(h)                                                 # f32 elementwise
    y = jnp.dot(h.astype(w2_ref.dtype), w2_ref[...],
                preferred_element_type=jnp.float32) + b2_ref[...]
    o_ref[...] = y.astype(o_ref.dtype)


def mlp_linear_forward(x, w1, b1, w2, b2, *, tm_max=512):
    """x: (..., C_in); w1: (C_in, H); b1: (1, H); w2: (H, C_out); b2: (1, C_out)."""
    lead = x.shape[:-1]
    c_in = x.shape[-1]
    hdim = w1.shape[1]
    c_out = w2.shape[1]
    m = int(math.prod(lead)) if lead else 1
    out_dtype = x.dtype
    mm_dtype = w1.dtype

    x2 = x.reshape(m, c_in)
    if x2.dtype != mm_dtype:
        x2 = x2.astype(mm_dtype)          # single boundary cast; halves kernel input read

    def vmem_est(tm):                     # bytes of VMEM live for a given row tile
        tiles = 2 * tm * c_in * _dsize(mm_dtype) + 2 * tm * c_out * _dsize(out_dtype)
        wts = (c_in * hdim + hdim * c_out) * _dsize(mm_dtype) + (hdim + c_out) * 4
        live = tm * hdim * (4 + _dsize(mm_dtype)) + tm * c_out * 4
        return tiles + wts + live

    tm = min(tm_max, _round_up(m, _SUBLANE))
    while tm > _SUBLANE and vmem_est(tm) > _VMEM_TILE_BUDGET:
        tm = _round_up(tm // 2, _SUBLANE)

    out = _pallas_mlp_call(
        _mlp_linear_kernel,
        jax.ShapeDtypeStruct((m, c_out), out_dtype),
        (pl.cdiv(m, tm),),
        pl.BlockSpec((tm, c_in), lambda i: (i, 0)),
        [(c_in, hdim), (1, hdim), (hdim, c_out), (1, c_out)],
        pl.BlockSpec((tm, c_out), lambda i: (i, 0)),
        (x2, w1, b1, w2, b2),
    )
    return out.reshape(*lead, c_out)


# ----------------------------------------------------------------------------
# use_conv1=True : Conv1d(k=3, same) -> GELU -> Conv1d(k=3, same), fused
# ----------------------------------------------------------------------------
def _conv3_same(x, w_ref, b, seq_len):
    """'same' Conv1d(k=3) on flattened (samples*seq_len, C) rows.

    Neighbor rows come from sublane rotations (XLU); rows that would cross a sample
    boundary are masked to zero, reproducing padding='same'. Each tap is a separate
    accumulating matmul (f32 accumulation) against a (C, C_out) weight slab, which
    avoids materializing an (R, 3C) im2col copy.
    """
    rows = x.shape[0]
    left = pltpu.roll(x, 1, axis=0)                 # row i -> x[i-1]
    right = pltpu.roll(x, rows - 1, axis=0)         # row i -> x[i+1]
    pos = jax.lax.broadcasted_iota(jnp.int32, (rows, 1), 0) % seq_len
    zero = jnp.zeros((), x.dtype)
    left = jnp.where(pos == 0, zero, left)
    right = jnp.where(pos == seq_len - 1, zero, right)
    acc = jnp.dot(left, w_ref[0], preferred_element_type=jnp.float32)
    acc = acc + jnp.dot(x, w_ref[1], preferred_element_type=jnp.float32)
    acc = acc + jnp.dot(right, w_ref[2], preferred_element_type=jnp.float32)
    return acc + b


def _mlp_conv1_kernel(x_ref, w1_ref, b1_ref, w2_ref, b2_ref, o_ref, *, seq_len):
    x = x_ref[...]                                  # (rows, C_in) bf16
    h = _conv3_same(x, w1_ref, b1_ref[...], seq_len)
    h = _gelu_tanh(h)                               # f32 elementwise
    h = h.astype(w2_ref.dtype)
    y = _conv3_same(h, w2_ref, b2_ref[...], seq_len)
    o_ref[...] = y.astype(o_ref.dtype)


def mlp_conv1_forward(x, w1, b1, w2, b2, *, samples_per_step=None, target_rows=512):
    """x: (B, L, C_in) channels-last (module input, before its internal transpose).

    w1: (3, C_in, H); w2: (3, H, C_out) per-tap packed weights; b1/b2: (1, H)/(1, C_out).
    """
    bsz, seq_len, c_in = x.shape
    hdim = w1.shape[-1]
    c_out = w2.shape[-1]
    out_dtype = x.dtype
    mm_dtype = w1.dtype

    def vmem_est(btv):
        r = btv * seq_len
        tiles = 2 * r * c_in * _dsize(mm_dtype) + 2 * r * c_out * _dsize(out_dtype)
        wts = 3 * (c_in * hdim + hdim * c_out) * _dsize(mm_dtype) + (hdim + c_out) * 4
        live = r * (2 * c_in * _dsize(mm_dtype)           # shifted neighbor copies
                    + hdim * (4 + 3 * _dsize(mm_dtype))   # h (f32) + bf16 copy + shifts
                    + c_out * 4)                          # f32 accumulator
        return tiles + wts + live

    if samples_per_step is not None:
        bt = max(1, min(samples_per_step, bsz))
    else:
        bt = max(1, min(bsz, target_rows // max(seq_len, 1)))
        # Keep several grid steps so input/output DMA overlaps compute and both
        # TensorCores get work (never default to a size-1 grid).
        if bsz >= 8:
            bt = min(bt, max(1, bsz // 8))
        elif bsz >= 2:
            bt = min(bt, max(1, bsz // 2))
        while bt > 1 and vmem_est(bt) > _VMEM_TILE_BUDGET:
            bt = max(1, bt // 2)

    # Row tile must be sublane-aligned (8) unless it spans the whole array.
    step = 8 // math.gcd(seq_len, 8)
    bt = max(step, (bt // step) * step)
    if bt > bsz or (bt * seq_len) % _SUBLANE:
        bt = bsz
    rows = bt * seq_len

    xf = x.reshape(bsz * seq_len, c_in)
    if xf.dtype != mm_dtype:
        xf = xf.astype(mm_dtype)

    kernel = functools.partial(_mlp_conv1_kernel, seq_len=seq_len)
    out = _pallas_mlp_call(
        kernel,
        jax.ShapeDtypeStruct((bsz * seq_len, c_out), out_dtype),
        (pl.cdiv(bsz, bt),),
        pl.BlockSpec((rows, c_in), lambda i: (i, 0)),
        [(3, c_in, hdim), (1, hdim), (3, hdim, c_out), (1, c_out)],
        pl.BlockSpec((rows, c_out), lambda i: (i, 0)),
        (xf, w1, b1, w2, b2),
    )
    return out.reshape(bsz, seq_len, c_out)


# ----------------------------------------------------------------------------
# Parameter construction (PyTorch-layout weights) and host-side packing
# ----------------------------------------------------------------------------
def init_params(key, in_features, hidden_features, out_features):
    kl1, kl2, kc1, kc2 = jax.random.split(key, 4)

    def linear_init(k, fan_in, fan_out):
        kw, kb = jax.random.split(k)
        bound = 1.0 / math.sqrt(fan_in)
        w = jax.random.uniform(kw, (fan_out, fan_in), jnp.float32, -bound, bound)
        b = jax.random.uniform(kb, (fan_out,), jnp.float32, -bound, bound)
        return w, b

    def conv_init(k, c_in, c_out, ksize=3):
        kw, kb = jax.random.split(k)
        bound = 1.0 / math.sqrt(c_in * ksize)
        w = jax.random.uniform(kw, (c_out, c_in, ksize), jnp.float32, -bound, bound)
        b = jax.random.uniform(kb, (c_out,), jnp.float32, -bound, bound)
        return w, b

    lin = (linear_init(kl1, in_features, hidden_features),
           linear_init(kl2, hidden_features, out_features))
    conv = (conv_init(kc1, in_features, hidden_features),
            conv_init(kc2, hidden_features, out_features))
    return lin, conv


def pack_linear(w, b, dtype=jnp.bfloat16):
    # torch Linear weight (out, in) -> kernel layout (in, out), bf16 MXU operand.
    return jnp.asarray(w).T.astype(dtype), jnp.asarray(b, jnp.float32).reshape(1, -1)


def pack_conv(w, b, dtype=jnp.bfloat16):
    # torch Conv1d weight (C_out, C_in, 3) -> per-tap (3, C_in, C_out), bf16 MXU operand.
    wt = jnp.transpose(jnp.asarray(w), (2, 1, 0)).astype(dtype)
    return wt, jnp.asarray(b, jnp.float32).reshape(1, -1)


# ----------------------------------------------------------------------------
# Pure-JAX references (same semantics, independent implementation path)
# ----------------------------------------------------------------------------
def _ref_linear(x, w, b):                      # w in torch layout (out, in)
    return x @ w.T + b


def _ref_conv1_same(x, w, b):                  # x (B, L, C), w (C_out, C_in, 3)
    bsz, seq_len, _ = x.shape
    xp = jnp.pad(x, ((0, 0), (1, 1), (0, 0)))
    y = jnp.zeros((bsz, seq_len, w.shape[0]), jnp.float32)
    for k in range(3):
        y = y + jnp.einsum("blc,oc->blo", xp[:, k:k + seq_len], w[:, :, k])
    return y + b


def ref_mlp_linear(x, p1, p2):
    return _ref_linear(_gelu_tanh(_ref_linear(x, *p1)), *p2)


def ref_mlp_conv1(x, p1, p2):
    return _ref_conv1_same(_gelu_tanh(_ref_conv1_same(x, *p1)), *p2)


if __name__ == "__main__":
    key = jax.random.PRNGKey(0)
    kx, kp = jax.random.split(key)

    B, L = 2, 16
    in_features, hidden_features, out_features = 16, 32, 16
    x = jax.random.normal(kx, (B, L, in_features), jnp.float32)

    lin_params, conv_params = init_params(kp, in_features, hidden_features, out_features)

    # bf16 matmul operands vs f32 reference: allow bf16-level tolerance.
    tol = dict(rtol=5e-2, atol=5e-2)

    # ---- use_conv1=False (Linear / Linear) ----
    (w1t, b1t), (w2t, b2t) = lin_params
    w1k, b1k = pack_linear(w1t, b1t)
    w2k, b2k = pack_linear(w2t, b2t)
    out_lin = jax.block_until_ready(mlp_linear_forward(x, w1k, b1k, w2k, b2k))
    ref_lin = ref_mlp_linear(x, (w1t, b1t), (w2t, b2t))
    assert out_lin.shape == (B, L, out_features), out_lin.shape
    assert out_lin.dtype == x.dtype, out_lin.dtype
    assert jnp.allclose(out_lin.astype(jnp.float32), ref_lin, **tol), \
        float(jnp.max(jnp.abs(out_lin.astype(jnp.float32) - ref_lin)))

    # ---- use_conv1=True (Conv1d k=3 'same' / Conv1d k=3 'same') ----
    (cw1, cb1), (cw2, cb2) = conv_params
    cw1k, cb1k = pack_conv(cw1, cb1)
    cw2k, cb2k = pack_conv(cw2, cb2)
    out_conv = jax.block_until_ready(mlp_conv1_forward(x, cw1k, cb1k, cw2k, cb2k))
    ref_conv = ref_mlp_conv1(x, (cw1, cb1), (cw2, cb2))
    assert out_conv.shape == (B, L, out_features), out_conv.shape
    assert out_conv.dtype == x.dtype, out_conv.dtype
    assert jnp.allclose(out_conv.astype(jnp.float32), ref_conv, **tol), \
        float(jnp.max(jnp.abs(out_conv.astype(jnp.float32) - ref_conv)))

    print("KERNEL_OK")
</pallas_src>

<mosaic_0001>
module attributes {stable_mosaic.version = 11 : i64} {
  func.func @_mlp_linear_kernel(%arg0: i32, %arg1: memref<32x16xbf16, #tpu.memory_space<vmem>>, %arg2: memref<16x32xbf16, #tpu.memory_space<vmem>>, %arg3: memref<1x32xf32, #tpu.memory_space<vmem>>, %arg4: memref<32x16xbf16, #tpu.memory_space<vmem>>, %arg5: memref<1x16xf32, #tpu.memory_space<vmem>>, %arg6: memref<32x16xf32, #tpu.memory_space<vmem>>) attributes {dimension_semantics = [#tpu.dimension_semantics<parallel>], iteration_bounds = array<i64: 1>, scalar_prefetch = 0 : i64, scratch_operands = 0 : i64, tpu.core_type = #tpu.core_type<tc>, window_params = [{transform_indices = @transform_0, window_bounds = array<i64: 32, 16>}, {pipeline_mode = #tpu.pipeline_mode<synchronous>, transform_indices = @transform_1, window_bounds = array<i64: 16, 32>}, {pipeline_mode = #tpu.pipeline_mode<synchronous>, transform_indices = @transform_2, window_bounds = array<i64: 1, 32>}, {pipeline_mode = #tpu.pipeline_mode<synchronous>, transform_indices = @transform_3, window_bounds = array<i64: 32, 16>}, {pipeline_mode = #tpu.pipeline_mode<synchronous>, transform_indices = @transform_4, window_bounds = array<i64: 1, 16>}, {transform_indices = @transform_5, window_bounds = array<i64: 32, 16>}]} {
    %c0 = arith.constant 0 : index
    %c0_0 = arith.constant 0 : index
    %0 = vector.load %arg1[%c0, %c0_0] : memref<32x16xbf16, #tpu.memory_space<vmem>>, vector<32x16xbf16>
    %c0_1 = arith.constant 0 : index
    %c0_2 = arith.constant 0 : index
    %1 = vector.load %arg2[%c0_1, %c0_2] : memref<16x32xbf16, #tpu.memory_space<vmem>>, vector<16x32xbf16>
    %cst = arith.constant dense<0.000000e+00> : vector<32x32xf32>
    %2 = tpu.matmul %0, %1, %cst {dimension_numbers = #tpu.dot_dimension_numbers<[1], [0], [0], [1], [0, 0, 1, 1], [], []>} : vector<32x16xbf16>, vector<16x32xbf16>, vector<32x32xf32> -> vector<32x32xf32>
    %c0_3 = arith.constant 0 : index
    %c0_4 = arith.constant 0 : index
    %3 = vector.load %arg3[%c0_3, %c0_4] : memref<1x32xf32, #tpu.memory_space<vmem>>, vector<1x32xf32>
    %4 = vector.broadcast %3 : vector<1x32xf32> to vector<32x32xf32>
    %5 = arith.addf %2, %4 : vector<32x32xf32>
    %cst_5 = arith.constant 5.000000e-01 : f32
    %6 = vector.broadcast %cst_5 : f32 to vector<32x32xf32>
    %7 = arith.mulf %6, %5 : vector<32x32xf32>
    %cst_6 = arith.constant 4.471500e-02 : f32
    %8 = vector.broadcast %cst_6 : f32 to vector<32x32xf32>
    %9 = arith.mulf %8, %5 : vector<32x32xf32>
    %10 = arith.mulf %9, %5 : vector<32x32xf32>
    %11 = arith.mulf %10, %5 : vector<32x32xf32>
    %12 = arith.addf %5, %11 : vector<32x32xf32>
    %cst_7 = arith.constant 0.797884583 : f32
    %13 = vector.broadcast %cst_7 : f32 to vector<32x32xf32>
    %14 = arith.mulf %13, %12 : vector<32x32xf32>
    %15 = math.tanh %14 : vector<32x32xf32>
    %cst_8 = arith.constant 1.000000e+00 : f32
    %16 = vector.broadcast %cst_8 : f32 to vector<32x32xf32>
    %17 = arith.addf %16, %15 : vector<32x32xf32>
    %18 = arith.mulf %7, %17 : vector<32x32xf32>
    %19 = arith.truncf %18 : vector<32x32xf32> to vector<32x32xbf16>
    %c0_9 = arith.constant 0 : index
    %c0_10 = arith.constant 0 : index
    %20 = vector.load %arg4[%c0_9, %c0_10] : memref<32x16xbf16, #tpu.memory_space<vmem>>, vector<32x16xbf16>
    %cst_11 = arith.constant dense<0.000000e+00> : vector<32x16xf32>
    %21 = tpu.matmul %19, %20, %cst_11 {dimension_numbers = #tpu.dot_dimension_numbers<[1], [0], [0], [1], [0, 0, 1, 1], [], []>} : vector<32x32xbf16>, vector<32x16xbf16>, vector<32x16xf32> -> vector<32x16xf32>
    %c0_12 = arith.constant 0 : index
    %c0_13 = arith.constant 0 : index
    %22 = vector.load %arg5[%c0_12, %c0_13] : memref<1x16xf32, #tpu.memory_space<vmem>>, vector<1x16xf32>
    %23 = vector.broadcast %22 : vector<1x16xf32> to vector<32x16xf32>
    %24 = arith.addf %21, %23 : vector<32x16xf32>
    %c0_14 = arith.constant 0 : index
    %c0_15 = arith.constant 0 : index
    %25 = vector.load %arg6[%c0_14, %c0_15] : memref<32x16xf32, #tpu.memory_space<vmem>>, vector<32x16xf32>
    tpu.vector_store %arg6[%c0_14, %c0_15], %24 {strides = array<i32>} : memref<32x16xf32, #tpu.memory_space<vmem>>, vector<32x16xf32>,
    return
  }
  func.func @transform_0(%arg0: i32) -> (i32, i32) {
    %c0_i32 = arith.constant 0 : i32
    %c0_i32_0 = arith.constant 0 : i32
    return %arg0, %c0_i32 : i32, i32
  }
  func.func @transform_1(%arg0: i32) -> (i32, i32) {
    %c0_i32 = arith.constant 0 : i32
    %c0_i32_0 = arith.constant 0 : i32
    %c0_i32_1 = arith.constant 0 : i32
    return %c0_i32, %c0_i32_0 : i32, i32
  }
  func.func @transform_2(%arg0: i32) -> (i32, i32) {
    %c0_i32 = arith.constant 0 : i32
    %c0_i32_0 = arith.constant 0 : i32
    %c0_i32_1 = arith.constant 0 : i32
    return %c0_i32, %c0_i32_0 : i32, i32
  }
  func.func @transform_3(%arg0: i32) -> (i32, i32) {
    %c0_i32 = arith.constant 0 : i32
    %c0_i32_0 = arith.constant 0 : i32
    %c0_i32_1 = arith.constant 0 : i32
    return %c0_i32, %c0_i32_0 : i32, i32
  }
  func.func @transform_4(%arg0: i32) -> (i32, i32) {
    %c0_i32 = arith.constant 0 : i32
    %c0_i32_0 = arith.constant 0 : i32
    %c0_i32_1 = arith.constant 0 : i32
    return %c0_i32, %c0_i32_0 : i32, i32
  }
  func.func @transform_5(%arg0: i32) -> (i32, i32) {
    %c0_i32 = arith.constant 0 : i32
    %c0_i32_0 = arith.constant 0 : i32
    return %arg0, %c0_i32 : i32, i32
  }
}

module attributes {stable_mosaic.version = 11 : i64} {
  func.func @_mlp_linear_kernel(%arg0: i32, %arg1: memref<32x16xbf16, #tpu.memory_space<vmem>>, %arg2: memref<16x32xbf16, #tpu.memory_space<vmem>>, %arg3: memref<1x32xf32, #tpu.memory_space<vmem>>, %arg4: memref<32x16xbf16, #tpu.memory_space<vmem>>, %arg5: memref<1x16xf32, #tpu.memory_space<vmem>>, %arg6: memref<32x16xf32, #tpu.memory_space<vmem>>) attributes {dimension_semantics = [#tpu.dimension_semantics<parallel>], iteration_bounds = array<i64: 1>, scalar_prefetch = 0 : i64, scratch_operands = 0 : i64, tpu.core_type = #tpu.core_type<tc>, window_params = [{transform_indices = @transform_0, window_bounds = array<i64: 32, 16>}, {pipeline_mode = #tpu.pipeline_mode<synchronous>, transform_indices = @transform_1, window_bounds = array<i64: 16, 32>}, {pipeline_mode = #tpu.pipeline_mode<synchronous>, transform_indices = @transform_2, window_bounds = array<i64: 1, 32>}, {pipeline_mode = #tpu.pipeline_mode<synchronous>, transform_indices = @transform_3, window_bounds = array<i64: 32, 16>}, {pipeline_mode = #tpu.pipeline_mode<synchronous>, transform_indices = @transform_4, window_bounds = array<i64: 1, 16>}, {transform_indices = @transform_5, window_bounds = array<i64: 32, 16>}]} {
    %c0 = arith.constant 0 : index
    %c0_0 = arith.constant 0 : index
    %0 = vector.load %arg1[%c0, %c0_0] : memref<32x16xbf16, #tpu.memory_space<vmem>>, vector<32x16xbf16>
    %c0_1 = arith.constant 0 : index
    %c0_2 = arith.constant 0 : index
    %1 = vector.load %arg2[%c0_1, %c0_2] : memref<16x32xbf16, #tpu.memory_space<vmem>>, vector<16x32xbf16>
    %cst = arith.constant dense<0.000000e+00> : vector<32x32xf32>
    %2 = tpu.matmul %0, %1, %cst {dimension_numbers = #tpu.dot_dimension_numbers<[1], [0], [0], [1], [0, 0, 1, 1], [], []>} : vector<32x16xbf16>, vector<16x32xbf16>, vector<32x32xf32> -> vector<32x32xf32>
    %c0_3 = arith.constant 0 : index
    %c0_4 = arith.constant 0 : index
    %3 = vector.load %arg3[%c0_3, %c0_4] : memref<1x32xf32, #tpu.memory_space<vmem>>, vector<1x32xf32>
    %4 = vector.broadcast %3 : vector<1x32xf32> to vector<32x32xf32>
    %5 = arith.addf %2, %4 : vector<32x32xf32>
    %cst_5 = arith.constant 5.000000e-01 : f32
    %6 = vector.broadcast %cst_5 : f32 to vector<32x32xf32>
    %7 = arith.mulf %6, %5 : vector<32x32xf32>
    %cst_6 = arith.constant 4.471500e-02 : f32
    %8 = vector.broadcast %cst_6 : f32 to vector<32x32xf32>
    %9 = arith.mulf %8, %5 : vector<32x32xf32>
    %10 = arith.mulf %9, %5 : vector<32x32xf32>
    %11 = arith.mulf %10, %5 : vector<32x32xf32>
    %12 = arith.addf %5, %11 : vector<32x32xf32>
    %cst_7 = arith.constant 0.797884583 : f32
    %13 = vector.broadcast %cst_7 : f32 to vector<32x32xf32>
    %14 = arith.mulf %13, %12 : vector<32x32xf32>
    %15 = math.tanh %14 : vector<32x32xf32>
    %cst_8 = arith.constant 1.000000e+00 : f32
    %16 = vector.broadcast %cst_8 : f32 to vector<32x32xf32>
    %17 = arith.addf %16, %15 : vector<32x32xf32>
    %18 = arith.mulf %7, %17 : vector<32x32xf32>
    %19 = arith.truncf %18 : vector<32x32xf32> to vector<32x32xbf16>
    %c0_9 = arith.constant 0 : index
    %c0_10 = arith.constant 0 : index
    %20 = vector.load %arg4[%c0_9, %c0_10] : memref<32x16xbf16, #tpu.memory_space<vmem>>, vector<32x16xbf16>
    %cst_11 = arith.constant dense<0.000000e+00> : vector<32x16xf32>
    %21 = tpu.matmul %19, %20, %cst_11 {dimension_numbers = #tpu.dot_dimension_numbers<[1], [0], [0], [1], [0, 0, 1, 1], [], []>} : vector<32x32xbf16>, vector<32x16xbf16>, vector<32x16xf32> -> vector<32x16xf32>
    %c0_12 = arith.constant 0 : index
    %c0_13 = arith.constant 0 : index
    %22 = vector.load %arg5[%c0_12, %c0_13] : memref<1x16xf32, #tpu.memory_space<vmem>>, vector<1x16xf32>
    %23 = vector.broadcast %22 : vector<1x16xf32> to vector<32x16xf32>
    %24 = arith.addf %21, %23 : vector<32x16xf32>
    %c0_14 = arith.constant 0 : index
    %c0_15 = arith.constant 0 : index
    %25 = vector.load %arg6[%c0_14, %c0_15] : memref<32x16xf32, #tpu.memory_space<vmem>>, vector<32x16xf32>
    tpu.vector_store %arg6[%c0_14, %c0_15], %24 {strides = array<i32>} : memref<32x16xf32, #tpu.memory_space<vmem>>, vector<32x16xf32>,
    return
  }
  func.func @transform_0(%arg0: i32) -> (i32, i32) {
    %c0_i32 = arith.constant 0 : i32
    %c0_i32_0 = arith.constant 0 : i32
    return %arg0, %c0_i32 : i32, i32
  }
  func.func @transform_1(%arg0: i32) -> (i32, i32) {
    %c0_i32 = arith.constant 0 : i32
    %c0_i32_0 = arith.constant 0 : i32
    %c0_i32_1 = arith.constant 0 : i32
    return %c0_i32, %c0_i32_0 : i32, i32
  }
  func.func @transform_2(%arg0: i32) -> (i32, i32) {
    %c0_i32 = arith.constant 0 : i32
    %c0_i32_0 = arith.constant 0 : i32
    %c0_i32_1 = arith.constant 0 : i32
    return %c0_i32, %c0_i32_0 : i32, i32
  }
  func.func @transform_3(%arg0: i32) -> (i32, i32) {
    %c0_i32 = arith.constant 0 : i32
    %c0_i32_0 = arith.constant 0 : i32
    %c0_i32_1 = arith.constant 0 : i32
    return %c0_i32, %c0_i32_0 : i32, i32
  }
  func.func @transform_4(%arg0: i32) -> (i32, i32) {
    %c0_i32 = arith.constant 0 : i32
    %c0_i32_0 = arith.constant 0 : i32
    %c0_i32_1 = arith.constant 0 : i32
    return %c0_i32, %c0_i32_0 : i32, i32
  }
  func.func @transform_5(%arg0: i32) -> (i32, i32) {
    %c0_i32 = arith.constant 0 : i32
    %c0_i32_0 = arith.constant 0 : i32
    return %arg0, %c0_i32 : i32, i32
  }
}

</mosaic_0001>

<bundles_post_ra>
// kernel: tpu_custom_call.1
= control target key start
LH: loop header
LB: loop body
LE: loop exit
PB: predicated region body
PF: predicated region fallthrough
CT: control target
= control target key end

     0   :  { %vm47_vm0 = vcmask 130048   ;;  %vm131_vm1 = vcmask 261120   ;;  %s276_s1 = inlined_call_operand.vmem [shape: bf16[16,32], index: 1, kind: input, shape index: {}]   ;;  %s277_s0 = inlined_call_operand.vmem [shape: bf16[32,16], index: 0, kind: input, shape index: {}]   ;;  %s278_s2 = inlined_call_operand.vmem [shape: f32[1,32], index: 2, kind: input, shape index: {}]   ;;  %s279_s4 = inlined_call_operand.vmem [shape: f32[1,16], index: 4, kind: input, shape index: {}]   ;;  %s280_s3 = inlined_call_operand.vmem [shape: bf16[32,16], index: 3, kind: input, shape index: {}]   ;;  %s281_s5 = inlined_call_operand.vmem [shape: f32[32,16], index: 5, kind: output, shape index: {}]  }
   0x1   :  { %v191_v0 = vld [vmem:[%s276_s1] sm:$0xff]  ;;  %v190_v2 = vld [vmem:[%s277_s0 + $0x8] sm:$0xff] }
   0x2   :  { %v189_v1 = vld [vmem:[%s277_s0] sm:$0xff]  ;;  %61 = vmatpush.bf16.msra.mxu0 %v191_v0  ;;  %194 = vmatpush.bf16.msra.mxu3 %v191_v0  ;;  %v193_v3 = vld [vmem:[%s280_s3 + $0x8] sm:$0xff] }
   0x3   :  { %144 = vmatpush.bf16.msra.mxu1 %v193_v3  ;;  %v192_v4 = vld [vmem:[%s280_s3] sm:$0xff]  ;;  %195 = vmatpush.bf16.msra.mxu2 %v193_v3 }
   0x4   :  { %v197_v5 = vld [vmem:[%s278_s2] ss:$0 sm:$0xff] }
   0x5   :  { %177 = vmatmul.msk.bf16.vlgmr.msra.gmra.mxu0 %vm47_vm0, %v189_v1  ;;  %178 = vmatmul.msk.bf16.vlgmr.msra.gmra.mxu3 %vm47_vm0, %v190_v2  ;;  %v198_v52 = vld [vmem:[%s279_s4] ss:$0 sm:$0xff] }
   0x7   :  { %145 = vmatpush.bf16.msra.mxu1 %v192_v4  ;;  %196 = vmatpush.bf16.msra.mxu2 %v192_v4 }
  0x82   :  { %v63_v6 = vpop.f32.mrf.mxu0 }
  0x83   :  { %v64_v7 = vadd.f32 %v197_v5, %v63_v6 }
  0x85   :  { %v77_v8 = vmul.f32 0.044715, %v64_v7  ;;  %v73_v37 = vmul.f32 0.5, %v64_v7 }
  0x87   :  { %v81_v9 = vmul.f32 %v77_v8, %v64_v7 }
  0x88   :  { %v68_v10 = vpop.f32.mrf.mxu3 }
  0x89   :  { %v69_v11 = vadd.f32 %v197_v5, %v68_v10  ;;  %v85_v12 = vmul.f32 %v81_v9, %v64_v7 }
  0x8a   :  { %v65_v13 = vpop.f32.mrf.mxu0 }
  0x8b   :  { %v79_v14 = vmul.f32 0.044715, %v69_v11  ;;  %v66_v15 = vadd.f32 %v197_v5, %v65_v13  ;;  %v89_v16 = vadd.f32 %v85_v12, %v64_v7  ;;  %v75_v46 = vmul.f32 0.5, %v69_v11 }
  0x8d   :  { %v83_v17 = vmul.f32 %v79_v14, %v69_v11  ;;  %v78_v18 = vmul.f32 0.044715, %v66_v15  ;;  %v93_v20 = vmul.f32 0.7978846, %v89_v16  ;;  %v74_v38 = vmul.f32 0.5, %v66_v15 }
  0x8f   :  { %v82_v19 = vmul.f32 %v78_v18, %v66_v15  ;;  %v87_v21 = vmul.f32 %v83_v17, %v69_v11  ;;  %199 = vtanh.f32 %v93_v20 }
  0x90   :  { %v70_v22 = vpop.f32.mrf.mxu3 }
  0x91   :  { %v71_v23 = vadd.f32 %v197_v5, %v70_v22  ;;  %v86_v24 = vmul.f32 %v82_v19, %v66_v15  ;;  %v91_v25 = vadd.f32 %v87_v21, %v69_v11 }
  0x93   :  { %v80_v26 = vmul.f32 0.044715, %v71_v23  ;;  %v90_v27 = vadd.f32 %v86_v24, %v66_v15  ;;  %v95_v30 = vmul.f32 0.7978846, %v91_v25  ;;  %v76_v47 = vmul.f32 0.5, %v71_v23 }
  0x95   :  { %v84_v28 = vmul.f32 %v80_v26, %v71_v23  ;;  %v94_v29 = vmul.f32 0.7978846, %v90_v27  ;;  %v200_v32 = vpop.eup %199 }
  0x96   :  { %v101_v35 = vadd.f32 1.0, %v200_v32 }
  0x97   :  { %201 = vtanh.f32 %v94_v29  ;;  %v88_v31 = vmul.f32 %v84_v28, %v71_v23 }
  0x98   :  { %203 = vtanh.f32 %v95_v30  ;;  %v105_v41 = vmul.f32 %v101_v35, %v73_v37 }
  0x99   :  { %v92_v33 = vadd.f32 %v88_v31, %v71_v23 }
  0x9b   :  { %v96_v34 = vmul.f32 0.7978846, %v92_v33 }
  0x9d   :  { %v202_v36 = vpop.eup %201  ;;  %205 = vtanh.f32 %v96_v34 }
  0x9e   :  { %v102_v39 = vadd.f32 1.0, %v202_v36  ;;  %v204_v40 = vpop.eup %203 }
  0x9f   :  { %v103_v44 = vadd.f32 1.0, %v204_v40 }
  0xa0   :  { %v106_v42 = vmul.f32 %v102_v39, %v74_v38 }
  0xa1   :  { %v107_v49 = vmul.f32 %v103_v44, %v75_v46 }
  0xa2   :  { %v109_v43 = vpack.c.bf16 %v106_v42, %v105_v41 }
  0xa3   :  { %v206_v45 = vpop.eup %205 }
  0xa4   :  { %187 = vmatmul.msk.bf16.vlgmr.msra.gmra.mxu1 %vm131_vm1, %v109_v43  ;;  %v104_v48 = vadd.f32 1.0, %v206_v45 }
  0xa6   :  { %v108_v50 = vmul.f32 %v104_v48, %v76_v47 }
  0xa8   :  { %v110_v51 = vpack.c.bf16 %v108_v50, %v107_v49 }
  0xaa   :  { %188 = vmatmul.msk.bf16.vlgmr.msra.gmra.mxu2 %vm131_vm1, %v110_v51 }
 0x121   :  { %v147_v53 = vpop.f32.mrf.mxu1 }
 0x122   :  { %v148_v54 = vadd.f32 %v198_v52, %v147_v53 }
 0x124   :  { %157 = vst.msk [vmem:[%s281_s5] sm:$0xff] %vm47_vm0, %v148_v54 }
 0x129   :  { %v149_v55 = vpop.f32.mrf.mxu1 }
 0x12a   :  { %v150_v56 = vadd.f32 %v198_v52, %v149_v55 }
 0x12c   :  { %158 = vst.msk [vmem:[%s281_s5 + $0x8] sm:$0xff] %vm47_vm0, %v150_v56 }
 0x12d   :  { %v152_v57 = vpop.f32.mrf.mxu2 }
 0x12e   :  { %v153_v58 = vadd.f32 %v198_v52, %v152_v57 }
 0x130   :  { %159 = vst.msk [vmem:[%s281_s5 + $0x10] sm:$0xff] %vm47_vm0, %v153_v58 }
 0x135   :  { %v154_v59 = vpop.f32.mrf.mxu2 }
 0x136   :  { %v155_v60 = vadd.f32 %v198_v52, %v154_v59 }
 0x138   :  { %160 = vst.msk [vmem:[%s281_s5 + $0x18] sm:$0xff] %vm47_vm0, %v155_v60 }

// kernel: tpu_custom_call.1
= control target key start
LH: loop header
LB: loop body
LE: loop exit
PB: predicated region body
PF: predicated region fallthrough
CT: control target
= control target key end

     0   :  { %vm47_vm0 = vcmask 130048   ;;  %vm131_vm1 = vcmask 261120   ;;  %s276_s1 = inlined_call_operand.vmem [shape: bf16[16,32], index: 1, kind: input, shape index: {}]   ;;  %s277_s0 = inlined_call_operand.vmem [shape: bf16[32,16], index: 0, kind: input, shape index: {}]   ;;  %s278_s2 = inlined_call_operand.vmem [shape: f32[1,32], index: 2, kind: input, shape index: {}]   ;;  %s279_s4 = inlined_call_operand.vmem [shape: f32[1,16], index: 4, kind: input, shape index: {}]   ;;  %s280_s3 = inlined_call_operand.vmem [shape: bf16[32,16], index: 3, kind: input, shape index: {}]   ;;  %s281_s5 = inlined_call_operand.vmem [shape: f32[32,16], index: 5, kind: output, shape index: {}]  }
   0x1   :  { %v191_v0 = vld [vmem:[%s276_s1] sm:$0xff]  ;;  %v190_v2 = vld [vmem:[%s277_s0 + $0x8] sm:$0xff] }
   0x2   :  { %v189_v1 = vld [vmem:[%s277_s0] sm:$0xff]  ;;  %61 = vmatpush.bf16.msra.mxu0 %v191_v0  ;;  %194 = vmatpush.bf16.msra.mxu3 %v191_v0  ;;  %v193_v3 = vld [vmem:[%s280_s3 + $0x8] sm:$0xff] }
   0x3   :  { %144 = vmatpush.bf16.msra.mxu1 %v193_v3  ;;  %v192_v4 = vld [vmem:[%s280_s3] sm:$0xff]  ;;  %195 = vmatpush.bf16.msra.mxu2 %v193_v3 }
   0x4   :  { %v197_v5 = vld [vmem:[%s278_s2] ss:$0 sm:$0xff] }
   0x5   :  { %177 = vmatmul.msk.bf16.vlgmr.msra.gmra.mxu0 %vm47_vm0, %v189_v1  ;;  %178 = vmatmul.msk.bf16.vlgmr.msra.gmra.mxu3 %vm47_vm0, %v190_v2  ;;  %v198_v52 = vld [vmem:[%s279_s4] ss:$0 sm:$0xff] }
   0x7   :  { %145 = vmatpush.bf16.msra.mxu1 %v192_v4  ;;  %196 = vmatpush.bf16.msra.mxu2 %v192_v4 }
  0x82   :  { %v63_v6 = vpop.f32.mrf.mxu0 }
  0x83   :  { %v64_v7 = vadd.f32 %v197_v5, %v63_v6 }
  0x85   :  { %v77_v8 = vmul.f32 0.044715, %v64_v7  ;;  %v73_v37 = vmul.f32 0.5, %v64_v7 }
  0x87   :  { %v81_v9 = vmul.f32 %v77_v8, %v64_v7 }
  0x88   :  { %v68_v10 = vpop.f32.mrf.mxu3 }
  0x89   :  { %v69_v11 = vadd.f32 %v197_v5, %v68_v10  ;;  %v85_v12 = vmul.f32 %v81_v9, %v64_v7 }
  0x8a   :  { %v65_v13 = vpop.f32.mrf.mxu0 }
  0x8b   :  { %v79_v14 = vmul.f32 0.044715, %v69_v11  ;;  %v66_v15 = vadd.f32 %v197_v5, %v65_v13  ;;  %v89_v16 = vadd.f32 %v85_v12, %v64_v7  ;;  %v75_v46 = vmul.f32 0.5, %v69_v11 }
  0x8d   :  { %v83_v17 = vmul.f32 %v79_v14, %v69_v11  ;;  %v78_v18 = vmul.f32 0.044715, %v66_v15  ;;  %v93_v20 = vmul.f32 0.7978846, %v89_v16  ;;  %v74_v38 = vmul.f32 0.5, %v66_v15 }
  0x8f   :  { %v82_v19 = vmul.f32 %v78_v18, %v66_v15  ;;  %v87_v21 = vmul.f32 %v83_v17, %v69_v11  ;;  %199 = vtanh.f32 %v93_v20 }
  0x90   :  { %v70_v22 = vpop.f32.mrf.mxu3 }
  0x91   :  { %v71_v23 = vadd.f32 %v197_v5, %v70_v22  ;;  %v86_v24 = vmul.f32 %v82_v19, %v66_v15  ;;  %v91_v25 = vadd.f32 %v87_v21, %v69_v11 }
  0x93   :  { %v80_v26 = vmul.f32 0.044715, %v71_v23  ;;  %v90_v27 = vadd.f32 %v86_v24, %v66_v15  ;;  %v95_v30 = vmul.f32 0.7978846, %v91_v25  ;;  %v76_v47 = vmul.f32 0.5, %v71_v23 }
  0x95   :  { %v84_v28 = vmul.f32 %v80_v26, %v71_v23  ;;  %v94_v29 = vmul.f32 0.7978846, %v90_v27  ;;  %v200_v32 = vpop.eup %199 }
  0x96   :  { %v101_v35 = vadd.f32 1.0, %v200_v32 }
  0x97   :  { %201 = vtanh.f32 %v94_v29  ;;  %v88_v31 = vmul.f32 %v84_v28, %v71_v23 }
  0x98   :  { %203 = vtanh.f32 %v95_v30  ;;  %v105_v41 = vmul.f32 %v101_v35, %v73_v37 }
  0x99   :  { %v92_v33 = vadd.f32 %v88_v31, %v71_v23 }
  0x9b   :  { %v96_v34 = vmul.f32 0.7978846, %v92_v33 }
  0x9d   :  { %v202_v36 = vpop.eup %201  ;;  %205 = vtanh.f32 %v96_v34 }
  0x9e   :  { %v102_v39 = vadd.f32 1.0, %v202_v36  ;;  %v204_v40 = vpop.eup %203 }
  0x9f   :  { %v103_v44 = vadd.f32 1.0, %v204_v40 }
  0xa0   :  { %v106_v42 = vmul.f32 %v102_v39, %v74_v38 }
  0xa1   :  { %v107_v49 = vmul.f32 %v103_v44, %v75_v46 }
  0xa2   :  { %v109_v43 = vpack.c.bf16 %v106_v42, %v105_v41 }
  0xa3   :  { %v206_v45 = vpop.eup %205 }
  0xa4   :  { %187 = vmatmul.msk.bf16.vlgmr.msra.gmra.mxu1 %vm131_vm1, %v109_v43  ;;  %v104_v48 = vadd.f32 1.0, %v206_v45 }
  0xa6   :  { %v108_v50 = vmul.f32 %v104_v48, %v76_v47 }
  0xa8   :  { %v110_v51 = vpack.c.bf16 %v108_v50, %v107_v49 }
  0xaa   :  { %188 = vmatmul.msk.bf16.vlgmr.msra.gmra.mxu2 %vm131_vm1, %v110_v51 }
 0x121   :  { %v147_v53 = vpop.f32.mrf.mxu1 }
 0x122   :  { %v148_v54 = vadd.f32 %v198_v52, %v147_v53 }
 0x124   :  { %157 = vst.msk [vmem:[%s281_s5] sm:$0xff] %vm47_vm0, %v148_v54 }
 0x129   :  { %v149_v55 = vpop.f32.mrf.mxu1 }
 0x12a   :  { %v150_v56 = vadd.f32 %v198_v52, %v149_v55 }
 0x12c   :  { %158 = vst.msk [vmem:[%s281_s5 + $0x8] sm:$0xff] %vm47_vm0, %v150_v56 }
 0x12d   :  { %v152_v57 = vpop.f32.mrf.mxu2 }
 0x12e   :  { %v153_v58 = vadd.f32 %v198_v52, %v152_v57 }
 0x130   :  { %159 = vst.msk [vmem:[%s281_s5 + $0x10] sm:$0xff] %vm47_vm0, %v153_v58 }
 0x135   :  { %v154_v59 = vpop.f32.mrf.mxu2 }
 0x136   :  { %v155_v60 = vadd.f32 %v198_v52, %v154_v59 }
 0x138   :  { %160 = vst.msk [vmem:[%s281_s5 + $0x18] sm:$0xff] %vm47_vm0, %v155_v60 }

</bundles_post_ra>
